<compile_context>
chip_gen: v7x
topology: tpu7x:2x2x1
jax: 0.10.0
libtpu: 0.0.40
codegen_flags: <defaults>
</compile_context>

<pallas_src>
import functools
import math

import jax
import jax.numpy as jnp
from jax.experimental import pallas as pl
from jax.experimental.pallas import tpu as pltpu

STATE_DIM = 4
HIDDEN = 128
ACTION_DIM = 2
LANE = 128  # lane-dense output width


def dqn_kernel(x_ref, w1_ref, b1_ref, w2_ref, b2_ref, w3_ref, b3_ref, out_ref):
    x = x_ref[...]        # (TB, 4)
    w1 = w1_ref[...]      # (4, 128)

    # Layer 1: Linear(4, 128) + ReLU.  K=4 wastes 124/128 of the MXU
    # contraction dim, so compute it as 4 broadcast FMAs on the VPU.
    h1 = b1_ref[...] + x[:, 0:1] * w1[0:1, :]
    h1 = h1 + x[:, 1:2] * w1[1:2, :]
    h1 = h1 + x[:, 2:3] * w1[2:3, :]
    h1 = h1 + x[:, 3:4] * w1[3:4, :]
    h1 = jnp.maximum(h1, 0.0)

    # Layer 2: NoisyLinear(128, 128) + ReLU (noisy weights pre-combined in the
    # wrapper: w2 = w2_mean + w2_std * w2_noise, b2 likewise).
    h2 = jnp.dot(h1, w2_ref[...], preferred_element_type=jnp.float32) + b2_ref[...]
    h2 = jnp.maximum(h2, 0.0)

    # Layer 3: NoisyLinear(128, 2), zero-padded to 128 output lanes so the
    # store is lane-dense; the wrapper slices back to the 2 real Q-values.
    out_ref[...] = (
        jnp.dot(h2, w3_ref[...], preferred_element_type=jnp.float32) + b3_ref[...]
    ).astype(out_ref.dtype)


def _round_up(x, m):
    return (x + m - 1) // m * m


@functools.partial(jax.jit, static_argnames=("block_b",))
def dqn_forward(x, params, *, block_b=256):
    """Fused Noisy-DQN forward.  x: (B, 4) float32 -> (B, 2) float32."""
    B = x.shape[0]
    # Batch tile: multiple of 8 sublanes, capped at block_b; pad batch so the
    # grid divides evenly (padded rows are zeros and get sliced away).
    TB = min(block_b, _round_up(B, 8))
    B_pad = _round_up(B, TB)
    if B_pad != B:
        x = jnp.pad(x, ((0, B_pad - B), (0, 0)))
    n_blocks = B_pad // TB

    # Pre-combine the noisy weights once per call (noise is fixed between
    # reset_noise() calls, so this is exactly the training-mode forward) and
    # zero-pad the 2-wide head to 128 lanes for a lane-dense output store.
    w2 = params["w2_mean"] + params["w2_std"] * params["w2_noise"]
    b2 = params["b2_mean"] + params["b2_std"] * params["b2_noise"]
    w3 = params["w3_mean"] + params["w3_std"] * params["w3_noise"]   # (128, 2)
    b3 = params["b3_mean"] + params["b3_std"] * params["b3_noise"]   # (1, 2)
    w3 = jnp.pad(w3, ((0, 0), (0, LANE - ACTION_DIM)))               # (128, 128)
    b3 = jnp.pad(b3, ((0, 0), (0, LANE - ACTION_DIM)))               # (1, 128)

    def resident(shape):
        # Whole-array block, same tile for every grid step -> stays in VMEM.
        return pl.BlockSpec(shape, lambda i: (0, 0))

    out_padded = pl.pallas_call(
        dqn_kernel,
        out_shape=jax.ShapeDtypeStruct((B_pad, LANE), jnp.float32),
        grid=(n_blocks,),
        in_specs=[
            pl.BlockSpec((TB, STATE_DIM), lambda i: (i, 0)),  # x: batch-tiled
            resident(params["w1"].shape),
            resident(params["b1"].shape),
            resident(w2.shape),
            resident(b2.shape),
            resident(w3.shape),
            resident(b3.shape),
        ],
        out_specs=pl.BlockSpec((TB, LANE), lambda i: (i, 0)),
        compiler_params=pltpu.CompilerParams(
            dimension_semantics=("parallel",),
            vmem_limit_bytes=32 << 20,
        ),
    )(x, params["w1"], params["b1"], w2, b2, w3, b3)

    return out_padded[:B, :ACTION_DIM]


def init_params(key):
    """Deterministic parameter init matching the PyTorch module's __init__."""
    ks = jax.random.split(key, 8)
    f32 = jnp.float32

    # nn.Linear(4, 128): kaiming_uniform(a=sqrt(5)) -> bound = 1/sqrt(in) = 0.5
    in1, out1 = STATE_DIM, HIDDEN
    bound1 = 1.0 / math.sqrt(in1)
    w1 = jax.random.uniform(ks[0], (in1, out1), f32, -bound1, bound1)
    b1 = jax.random.uniform(ks[1], (1, out1), f32, -bound1, bound1)

    # NoisyLinear(128, 128)
    in2, out2 = HIDDEN, HIDDEN
    r2 = math.sqrt(3.0 / in2)
    n2 = math.sqrt(1.0 / out2)
    w2_mean = jax.random.uniform(ks[2], (in2, out2), f32, -r2, r2)
    w2_std = jnp.full((in2, out2), 0.017, f32)
    w2_noise = jax.random.uniform(ks[3], (in2, out2), f32, -n2, n2)
    b2_mean = jax.random.uniform(ks[4], (1, out2), f32, -r2, r2)
    b2_std = jnp.full((1, out2), 0.017, f32)
    b2_noise = jnp.full((1, out2), 0.5 * n2, f32)

    # NoisyLinear(128, 2)
    in3, out3 = HIDDEN, ACTION_DIM
    r3 = math.sqrt(3.0 / in3)
    n3 = math.sqrt(1.0 / out3)
    w3_mean = jax.random.uniform(ks[5], (in3, out3), f32, -r3, r3)
    w3_std = jnp.full((in3, out3), 0.017, f32)
    w3_noise = jax.random.uniform(ks[6], (in3, out3), f32, -n3, n3)
    b3_mean = jax.random.uniform(ks[7], (1, out3), f32, -r3, r3)
    b3_std = jnp.full((1, out3), 0.017, f32)
    b3_noise = jnp.full((1, out3), 0.5 * n3, f32)

    return dict(
        w1=w1, b1=b1,
        w2_mean=w2_mean, w2_std=w2_std, w2_noise=w2_noise,
        b2_mean=b2_mean, b2_std=b2_std, b2_noise=b2_noise,
        w3_mean=w3_mean, w3_std=w3_std, w3_noise=w3_noise,
        b3_mean=b3_mean, b3_std=b3_std, b3_noise=b3_noise,
    )


def dqn_forward_ref(x, p):
    """Pure-JAX reference for correctness checking (training-mode noisy)."""
    w1 = p["w1"]
    # Layer 1 written elementwise to mirror the exact-f32 VPU path.
    h1 = (p["b1"]
          + x[:, 0:1] * w1[0:1, :] + x[:, 1:2] * w1[1:2, :]
          + x[:, 2:3] * w1[2:3, :] + x[:, 3:4] * w1[3:4, :])
    h1 = jnp.maximum(h1, 0.0)
    w2 = p["w2_mean"] + p["w2_std"] * p["w2_noise"]
    b2 = p["b2_mean"] + p["b2_std"] * p["b2_noise"]
    h2 = jnp.maximum(h1 @ w2 + b2, 0.0)
    w3 = p["w3_mean"] + p["w3_std"] * p["w3_noise"]
    b3 = p["b3_mean"] + p["b3_std"] * p["b3_noise"]
    return h2 @ w3 + b3


if __name__ == "__main__":
    # TODO(synk): act()'s epsilon-greedy / argmax logic stays host-side.
    key = jax.random.PRNGKey(0)
    pkey, xkey = jax.random.split(key)
    params = init_params(pkey)

    # Batch of 8 CartPole-style states (state dim = 4, action dim = 2).
    x = jax.random.normal(xkey, (8, 4), jnp.float32)

    q = dqn_forward(x, params)
    jax.block_until_ready(q)

    q_ref = dqn_forward_ref(x, params)
    assert q.shape == (8, 2)
    assert jnp.allclose(q, q_ref, atol=1e-4, rtol=1e-4)

    print("KERNEL_OK")
</pallas_src>

<mosaic_0001>
module attributes {stable_mosaic.version = 11 : i64} {
  func.func @dqn_kernel(%arg0: i32, %arg1: memref<8x4xf32, #tpu.memory_space<vmem>>, %arg2: memref<4x128xf32, #tpu.memory_space<vmem>>, %arg3: memref<1x128xf32, #tpu.memory_space<vmem>>, %arg4: memref<128x128xf32, #tpu.memory_space<vmem>>, %arg5: memref<1x128xf32, #tpu.memory_space<vmem>>, %arg6: memref<128x128xf32, #tpu.memory_space<vmem>>, %arg7: memref<1x128xf32, #tpu.memory_space<vmem>>, %arg8: memref<8x128xf32, #tpu.memory_space<vmem>>) attributes {dimension_semantics = [#tpu.dimension_semantics<parallel>], iteration_bounds = array<i64: 1>, scalar_prefetch = 0 : i64, scratch_operands = 0 : i64, tpu.core_type = #tpu.core_type<tc>, window_params = [{transform_indices = @transform_0, window_bounds = array<i64: 8, 4>}, {pipeline_mode = #tpu.pipeline_mode<synchronous>, transform_indices = @transform_1, window_bounds = array<i64: 4, 128>}, {pipeline_mode = #tpu.pipeline_mode<synchronous>, transform_indices = @transform_2, window_bounds = array<i64: 1, 128>}, {pipeline_mode = #tpu.pipeline_mode<synchronous>, transform_indices = @transform_3, window_bounds = array<i64: 128, 128>}, {pipeline_mode = #tpu.pipeline_mode<synchronous>, transform_indices = @transform_4, window_bounds = array<i64: 1, 128>}, {pipeline_mode = #tpu.pipeline_mode<synchronous>, transform_indices = @transform_5, window_bounds = array<i64: 128, 128>}, {pipeline_mode = #tpu.pipeline_mode<synchronous>, transform_indices = @transform_6, window_bounds = array<i64: 1, 128>}, {transform_indices = @transform_7, window_bounds = array<i64: 8, 128>}]} {
    %c0 = arith.constant 0 : index
    %c0_0 = arith.constant 0 : index
    %0 = vector.load %arg1[%c0, %c0_0] : memref<8x4xf32, #tpu.memory_space<vmem>>, vector<8x4xf32>
    %c0_1 = arith.constant 0 : index
    %c0_2 = arith.constant 0 : index
    %1 = vector.load %arg2[%c0_1, %c0_2] : memref<4x128xf32, #tpu.memory_space<vmem>>, vector<4x128xf32>
    %c0_3 = arith.constant 0 : index
    %c0_4 = arith.constant 0 : index
    %2 = vector.load %arg3[%c0_3, %c0_4] : memref<1x128xf32, #tpu.memory_space<vmem>>, vector<1x128xf32>
    %3 = vector.extract_strided_slice %0 {offsets = [0, 0], sizes = [8, 1], strides = [1, 1]} : vector<8x4xf32> to vector<8x1xf32>
    %4 = vector.extract_strided_slice %1 {offsets = [0, 0], sizes = [1, 128], strides = [1, 1]} : vector<4x128xf32> to vector<1x128xf32>
    %5 = vector.broadcast %3 : vector<8x1xf32> to vector<8x128xf32>
    %6 = vector.broadcast %4 : vector<1x128xf32> to vector<8x128xf32>
    %7 = arith.mulf %5, %6 : vector<8x128xf32>
    %8 = vector.broadcast %2 : vector<1x128xf32> to vector<8x128xf32>
    %9 = arith.addf %8, %7 : vector<8x128xf32>
    %10 = vector.extract_strided_slice %0 {offsets = [0, 1], sizes = [8, 1], strides = [1, 1]} : vector<8x4xf32> to vector<8x1xf32>
    %11 = vector.extract_strided_slice %1 {offsets = [1, 0], sizes = [1, 128], strides = [1, 1]} : vector<4x128xf32> to vector<1x128xf32>
    %12 = vector.broadcast %10 : vector<8x1xf32> to vector<8x128xf32>
    %13 = vector.broadcast %11 : vector<1x128xf32> to vector<8x128xf32>
    %14 = arith.mulf %12, %13 : vector<8x128xf32>
    %15 = arith.addf %9, %14 : vector<8x128xf32>
    %16 = vector.extract_strided_slice %0 {offsets = [0, 2], sizes = [8, 1], strides = [1, 1]} : vector<8x4xf32> to vector<8x1xf32>
    %17 = vector.extract_strided_slice %1 {offsets = [2, 0], sizes = [1, 128], strides = [1, 1]} : vector<4x128xf32> to vector<1x128xf32>
    %18 = vector.broadcast %16 : vector<8x1xf32> to vector<8x128xf32>
    %19 = vector.broadcast %17 : vector<1x128xf32> to vector<8x128xf32>
    %20 = arith.mulf %18, %19 : vector<8x128xf32>
    %21 = arith.addf %15, %20 : vector<8x128xf32>
    %22 = vector.extract_strided_slice %0 {offsets = [0, 3], sizes = [8, 1], strides = [1, 1]} : vector<8x4xf32> to vector<8x1xf32>
    %23 = vector.extract_strided_slice %1 {offsets = [3, 0], sizes = [1, 128], strides = [1, 1]} : vector<4x128xf32> to vector<1x128xf32>
    %24 = vector.broadcast %22 : vector<8x1xf32> to vector<8x128xf32>
    %25 = vector.broadcast %23 : vector<1x128xf32> to vector<8x128xf32>
    %26 = arith.mulf %24, %25 : vector<8x128xf32>
    %27 = arith.addf %21, %26 : vector<8x128xf32>
    %cst = arith.constant 0.000000e+00 : f32
    %28 = vector.broadcast %cst : f32 to vector<8x128xf32>
    %29 = arith.maximumf %27, %28 : vector<8x128xf32>
    %c0_5 = arith.constant 0 : index
    %c0_6 = arith.constant 0 : index
    %30 = vector.load %arg4[%c0_5, %c0_6] : memref<128x128xf32, #tpu.memory_space<vmem>>, vector<128x128xf32>
    %cst_7 = arith.constant dense<0.000000e+00> : vector<8x128xf32>
    %31 = tpu.matmul %29, %30, %cst_7 {dimension_numbers = #tpu.dot_dimension_numbers<[1], [0], [0], [1], [0, 0, 1, 1], [], []>} : vector<8x128xf32>, vector<128x128xf32>, vector<8x128xf32> -> vector<8x128xf32>
    %c0_8 = arith.constant 0 : index
    %c0_9 = arith.constant 0 : index
    %32 = vector.load %arg5[%c0_8, %c0_9] : memref<1x128xf32, #tpu.memory_space<vmem>>, vector<1x128xf32>
    %33 = vector.broadcast %32 : vector<1x128xf32> to vector<8x128xf32>
    %34 = arith.addf %31, %33 : vector<8x128xf32>
    %cst_10 = arith.constant 0.000000e+00 : f32
    %35 = vector.broadcast %cst_10 : f32 to vector<8x128xf32>
    %36 = arith.maximumf %34, %35 : vector<8x128xf32>
    %c0_11 = arith.constant 0 : index
    %c0_12 = arith.constant 0 : index
    %37 = vector.load %arg6[%c0_11, %c0_12] : memref<128x128xf32, #tpu.memory_space<vmem>>, vector<128x128xf32>
    %cst_13 = arith.constant dense<0.000000e+00> : vector<8x128xf32>
    %38 = tpu.matmul %36, %37, %cst_13 {dimension_numbers = #tpu.dot_dimension_numbers<[1], [0], [0], [1], [0, 0, 1, 1], [], []>} : vector<8x128xf32>, vector<128x128xf32>, vector<8x128xf32> -> vector<8x128xf32>
    %c0_14 = arith.constant 0 : index
    %c0_15 = arith.constant 0 : index
    %39 = vector.load %arg7[%c0_14, %c0_15] : memref<1x128xf32, #tpu.memory_space<vmem>>, vector<1x128xf32>
    %40 = vector.broadcast %39 : vector<1x128xf32> to vector<8x128xf32>
    %41 = arith.addf %38, %40 : vector<8x128xf32>
    %c0_16 = arith.constant 0 : index
    %c0_17 = arith.constant 0 : index
    %42 = vector.load %arg8[%c0_16, %c0_17] : memref<8x128xf32, #tpu.memory_space<vmem>>, vector<8x128xf32>
    tpu.vector_store %arg8[%c0_16, %c0_17], %41 {strides = array<i32>} : memref<8x128xf32, #tpu.memory_space<vmem>>, vector<8x128xf32>,
    return
  }
  func.func @transform_0(%arg0: i32) -> (i32, i32) {
    %c0_i32 = arith.constant 0 : i32
    %c0_i32_0 = arith.constant 0 : i32
    return %arg0, %c0_i32 : i32, i32
  }
  func.func @transform_1(%arg0: i32) -> (i32, i32) {
    %c0_i32 = arith.constant 0 : i32
    %c0_i32_0 = arith.constant 0 : i32
    %c0_i32_1 = arith.constant 0 : i32
    return %c0_i32, %c0_i32_0 : i32, i32
  }
  func.func @transform_2(%arg0: i32) -> (i32, i32) {
    %c0_i32 = arith.constant 0 : i32
    %c0_i32_0 = arith.constant 0 : i32
    %c0_i32_1 = arith.constant 0 : i32
    return %c0_i32, %c0_i32_0 : i32, i32
  }
  func.func @transform_3(%arg0: i32) -> (i32, i32) {
    %c0_i32 = arith.constant 0 : i32
    %c0_i32_0 = arith.constant 0 : i32
    %c0_i32_1 = arith.constant 0 : i32
    return %c0_i32, %c0_i32_0 : i32, i32
  }
  func.func @transform_4(%arg0: i32) -> (i32, i32) {
    %c0_i32 = arith.constant 0 : i32
    %c0_i32_0 = arith.constant 0 : i32
    %c0_i32_1 = arith.constant 0 : i32
    return %c0_i32, %c0_i32_0 : i32, i32
  }
  func.func @transform_5(%arg0: i32) -> (i32, i32) {
    %c0_i32 = arith.constant 0 : i32
    %c0_i32_0 = arith.constant 0 : i32
    %c0_i32_1 = arith.constant 0 : i32
    return %c0_i32, %c0_i32_0 : i32, i32
  }
  func.func @transform_6(%arg0: i32) -> (i32, i32) {
    %c0_i32 = arith.constant 0 : i32
    %c0_i32_0 = arith.constant 0 : i32
    %c0_i32_1 = arith.constant 0 : i32
    return %c0_i32, %c0_i32_0 : i32, i32
  }
  func.func @transform_7(%arg0: i32) -> (i32, i32) {
    %c0_i32 = arith.constant 0 : i32
    %c0_i32_0 = arith.constant 0 : i32
    return %arg0, %c0_i32 : i32, i32
  }
}

</mosaic_0001>

<bundles_post_ra>
// kernel: mul.6
= control target key start
LH: loop header
LB: loop body
LE: loop exit
PB: predicated region body
PF: predicated region fallthrough
CT: control target
= control target key end

     0   :  { %s34_s0 = inlined_call_operand.vmem [shape: f32[128,2], index: 0, kind: input, shape index: {}]   ;;  %s35_s1 = inlined_call_operand.vmem [shape: f32[128,2], index: 1, kind: input, shape index: {}]   ;;  %s36_s2 = inlined_call_operand.vmem [shape: f32[128,2], index: 2, kind: output, shape index: {}]  }
   0x1   :  { %v3_v0 = vld [vmem:[%s34_s0] sm:$0x3] }
   0x2   :  { %v4_v1 = vld [vmem:[%s35_s1] sm:$0x3] }
   0x3   :  { %v7_v2 = vmul.f32 %v4_v1, %v3_v0 }
   0x5   :  { %9 = vst [vmem:[%s36_s2] sm:$0x3] %v7_v2 }

// kernel: dqn_forward.1
= control target key start
LH: loop header
LB: loop body
LE: loop exit
PB: predicated region body
PF: predicated region fallthrough
CT: control target
= control target key end

     0   :  { %v436_v0 = vmov 0   ;;  %v437_v2 = vmov 2   ;;  %v438_v8 = vmov 0.0|0.0   ;;  %v439_v12 = vmov 1   ;;  %s613_s0 = inlined_call_operand.vmem [shape: f32[8,4], index: 0, kind: input, shape index: {}]   ;;  %s614_s3 = inlined_call_operand.vmem [shape: f32[128,128], index: 3, kind: input, shape index: {}]   ;;  %s615_s5 = inlined_call_operand.vmem [shape: f32[128,128], index: 5, kind: input, shape index: {}]   ;;  %s616_s1 = inlined_call_operand.vmem [shape: f32[4,128], index: 1, kind: input, shape index: {}]   ;;  %s617_s2 = inlined_call_operand.vmem [shape: f32[1,128], index: 2, kind: input, shape index: {}]   ;;  %s618_s4 = inlined_call_operand.vmem [shape: f32[1,128], index: 4, kind: input, shape index: {}]   ;;  %s619_s6 = inlined_call_operand.vmem [shape: f32[1,128], index: 6, kind: input, shape index: {}]   ;;  %s620_s7 = inlined_call_operand.vmem [shape: f32[8,128], index: 7, kind: output, shape index: {}]  }
   0x1   :  { %431 = vset.pattern.permute.xlu0 %v436_v0  ;;  %v26_v1 = vld [vmem:[%s613_s0] sm:$0xff]  ;;  %433 = vset.pattern.permute.xlu1 %v437_v2  ;;  %v78_v4 = vld [vmem:[%s614_s3 + $0x8] sm:$0xff]  ;;  %v79_v6 = vld [vmem:[%s614_s3 + $0x10] sm:$0xff]  ;;  %v440_v13 = vmov 3   ;;  %vm441_vm0 = vmmov 0   ;;  %v442_v21 = vmov 0.0   ;;  %v34_v52 = vlaneseq }
   0x2   :  { %v77_v3 = vld [vmem:[%s614_s3] sm:$0xff]  ;;  %31 = vperm.xlu0 %431, %v26_v1   ;;  %57 = vperm.xlu1 %433, %v26_v1   ;;  %v80_v7 = vld [vmem:[%s614_s3 + $0x18] sm:$0xff]  ;;  %v82_v11 = vld [vmem:[%s614_s3 + $0x28] sm:$0xff] }
   0x3   :  { %v377_v5 = vpack.c.bf16 %v78_v4, %v77_v3  ;;  %376 = vmatprep.subr.bf16.mxu0 %v438_v8  ;;  %400 = vmatprep.subr.bf16.mxu1 %v438_v8  ;;  %v380_v9 = vpack.c.bf16 %v80_v7, %v79_v6  ;;  %v81_v10 = vld [vmem:[%s614_s3 + $0x20] sm:$0xff]  ;;  %v83_v15 = vld [vmem:[%s614_s3 + $0x30] sm:$0xff]  ;;  %v84_v16 = vld [vmem:[%s614_s3 + $0x38] sm:$0xff]  ;;  %v35_v53 = vshrl.u32 %v34_v52, 7 }
   0x4   :  { %v383_v14 = vpack.c.bf16 %v82_v11, %v81_v10  ;;  %v386_v17 = vpack.c.bf16 %v84_v16, %v83_v15  ;;  %v85_v18 = vld [vmem:[%s614_s3 + $0x40] sm:$0xff]  ;;  %v86_v19 = vld [vmem:[%s614_s3 + $0x48] sm:$0xff]  ;;  %338 = vmatprep.mubr.msk.f32.mxu0 %vm441_vm0, %v442_v21  ;;  %v87_v22 = vld [vmem:[%s614_s3 + $0x50] sm:$0xff]  ;;  %373 = vmatprep.mubr.msk.f32.mxu1 %vm441_vm0, %v442_v21 }
   0x5   :  { %378 = vmatpush3.bf16.msra.mxu0 %v377_v5  ;;  %v389_v20 = vpack.c.bf16 %v86_v19, %v85_v18  ;;  %v88_v23 = vld [vmem:[%s614_s3 + $0x58] sm:$0xff]  ;;  %v171_v24 = vld [vmem:[%s615_s5] sm:$0xff]  ;;  %v172_v25 = vld [vmem:[%s615_s5 + $0x8] sm:$0xff]  ;;  %v36_v54 = vsub.s32 0, %v35_v53  ;;  %v52_v57 = vsub.s32 1, %v35_v53  ;;  %v62_v59 = vsub.s32 2, %v35_v53 }
   0x6   :  { %379 = vmatprep.subr.bf16.mxu0 %v438_v8  ;;  %432 = vset.pattern.permute.xlu0 %v439_v12  ;;  %v173_v26 = vld [vmem:[%s615_s5 + $0x10] sm:$0xff]  ;;  %v401_v27 = vpack.c.bf16 %v172_v25, %v171_v24  ;;  %v174_v28 = vld [vmem:[%s615_s5 + $0x18] sm:$0xff]  ;;  %v392_v29 = vpack.c.bf16 %v88_v23, %v87_v22  ;;  %v89_v30 = vld [vmem:[%s614_s3 + $0x60] sm:$0xff]  ;;  %v72_v61 = vsub.s32 3, %v35_v53 }
   0x7   :  { %434 = vset.pattern.permute.xlu1 %v440_v13  ;;  %47 = vperm.xlu0 %432, %v26_v1   ;;  %v90_v31 = vld [vmem:[%s614_s3 + $0x68] sm:$0xff]  ;;  %v404_v32 = vpack.c.bf16 %v174_v28, %v173_v26  ;;  %v175_v33 = vld [vmem:[%s615_s5 + $0x20] sm:$0xff]  ;;  %v91_v36 = vld [vmem:[%s614_s3 + $0x70] sm:$0xff] }
   0x8   :  { %67 = vperm.xlu1 %434, %v26_v1   ;;  %402 = vmatpush3.bf16.msra.mxu1 %v401_v27  ;;  %v176_v34 = vld [vmem:[%s615_s5 + $0x28] sm:$0xff]  ;;  %v395_v35 = vpack.c.bf16 %v90_v31, %v89_v30  ;;  %v92_v37 = vld [vmem:[%s614_s3 + $0x78] sm:$0xff]  ;;  %v177_v39 = vld [vmem:[%s615_s5 + $0x30] sm:$0xff] }
   0x9   :  { %381 = vmatpush3.bf16.msra.mxu0 %v380_v9  ;;  %403 = vmatprep.subr.bf16.mxu1 %v438_v8  ;;  %v407_v38 = vpack.c.bf16 %v176_v34, %v175_v33  ;;  %v178_v40 = vld [vmem:[%s615_s5 + $0x38] sm:$0xff]  ;;  %v398_v41 = vpack.c.bf16 %v92_v37, %v91_v36  ;;  %v179_v43 = vld [vmem:[%s615_s5 + $0x40] sm:$0xff]  ;;  %v180_v44 = vld [vmem:[%s615_s5 + $0x48] sm:$0xff] }
   0xa   :  { %382 = vmatprep.subr.bf16.mxu0 %v438_v8  ;;  %v410_v42 = vpack.c.bf16 %v178_v40, %v177_v39  ;;  %v413_v45 = vpack.c.bf16 %v180_v44, %v179_v43  ;;  %v181_v46 = vld [vmem:[%s615_s5 + $0x50] sm:$0xff]  ;;  %v182_v47 = vld [vmem:[%s615_s5 + $0x58] sm:$0xff]  ;;  %v183_v49 = vld [vmem:[%s615_s5 + $0x60] sm:$0xff] }
   0xb   :  { %435 = vset.pattern.permute.xlu0 %v440_v13  ;;  %v416_v48 = vpack.c.bf16 %v182_v47, %v181_v46  ;;  %v184_v50 = vld [vmem:[%s615_s5 + $0x68] sm:$0xff]  ;;  %v27_v55 = vld [vmem:[%s616_s1] sm:$0xf]  ;;  %v185_v13 = vld [vmem:[%s615_s5 + $0x70] sm:$0xff] }
   0xc   :  { %405 = vmatpush3.bf16.msra.mxu1 %v404_v32  ;;  %v419_v51 = vpack.c.bf16 %v184_v50, %v183_v49  ;;  %v37_v56 = vrot.slane %v27_v55, %v36_v54  ;;  %v53_v63 = vrot.slane %v27_v55, %v52_v57  ;;  %v269_v0 = vld [vmem:[%s617_s2] ss:$0 sm:$0xff]  ;;  %v63_v1 = vrot.slane %v27_v55, %v62_v59 }
   0xd   :  { %384 = vmatpush3.bf16.msra.mxu0 %v383_v14  ;;  %406 = vmatprep.subr.bf16.mxu1 %v438_v8  ;;  %v73_v2 = vrot.slane %v27_v55, %v72_v61  ;;  %v186_v14 = vld [vmem:[%s615_s5 + $0x78] sm:$0xff]  ;;  %v270_v16 = vld [vmem:[%s618_s4] ss:$0 sm:$0xff] }
   0xe   :  { %385 = vmatprep.subr.bf16.mxu0 %v438_v8  ;;  %v422_v15 = vpack.c.bf16 %v186_v14, %v185_v13  ;;  %v271_v21 = vld [vmem:[%s619_s6] ss:$0 sm:$0xff] }
  0x10   :  { %408 = vmatpush3.bf16.msra.mxu1 %v407_v38 }
  0x11   :  { %387 = vmatpush3.bf16.msra.mxu0 %v386_v17  ;;  %409 = vmatprep.subr.bf16.mxu1 %v438_v8 }
  0x12   :  { %388 = vmatprep.subr.bf16.mxu0 %v438_v8 }
  0x14   :  { %411 = vmatpush3.bf16.msra.mxu1 %v410_v42 }
  0x15   :  { %390 = vmatpush3.bf16.msra.mxu0 %v389_v20  ;;  %412 = vmatprep.subr.bf16.mxu1 %v438_v8 }
  0x16   :  { %391 = vmatprep.subr.bf16.mxu0 %v438_v8 }
  0x18   :  { %414 = vmatpush3.bf16.msra.mxu1 %v413_v45 }
  0x19   :  { %393 = vmatpush3.bf16.msra.mxu0 %v392_v29  ;;  %415 = vmatprep.subr.bf16.mxu1 %v438_v8 }
  0x1a   :  { %394 = vmatprep.subr.bf16.mxu0 %v438_v8 }
  0x1c   :  { %417 = vmatpush3.bf16.msra.mxu1 %v416_v48 }
  0x1d   :  { %396 = vmatpush3.bf16.msra.mxu0 %v395_v35  ;;  %418 = vmatprep.subr.bf16.mxu1 %v438_v8 }
  0x1e   :  { %397 = vmatprep.subr.bf16.mxu0 %v438_v8 }
  0x20   :  { %420 = vmatpush3.bf16.msra.mxu1 %v419_v51 }
  0x21   :  { %399 = vmatpush3.bf16.msra.mxu0 %v398_v41  ;;  %421 = vmatprep.subr.bf16.mxu1 %v438_v8 }
  0x24   :  { %423 = vmatpush3.bf16.msra.mxu1 %v422_v15 }
  0x81   :  { %v32_v58 = vpop.permute.xlu0 %31  ;;  %v58_v60 = vpop.permute.xlu1 %57 }
  0x82   :  { %v38_v62 = vmul.f32 %v37_v56, %v32_v58  ;;  %v64_v7 = vmul.f32 %v63_v1, %v58_v60 }
  0x84   :  { %v45_v5 = vadd.f32 %v269_v0, %v38_v62 }
  0x86   :  { %v48_v3 = vpop.permute.xlu0 %47 }
  0x87   :  { %v68_v4 = vpop.permute.xlu1 %67  ;;  %v54_v6 = vmul.f32 %v53_v63, %v48_v3 }
  0x88   :  { %v74_v9 = vmul.f32 %v73_v2, %v68_v4 }
  0x89   :  { %v55_v8 = vadd.f32 %v54_v6, %v45_v5 }
  0x8b   :  { %v65_v10 = vadd.f32 %v64_v7, %v55_v8 }
  0x8d   :  { %v75_v11 = vadd.f32 %v74_v9, %v65_v10 }
  0x8f   :  { %v76_v12 = vmax.f32 %v75_v11, 0.0 }
  0x91   :  { %339 = vmatmul.mubr.f32.vlgmr.msra.gmra.mrb[0].mxu0 %v76_v12 }
 0x164   :  { %v166_v17 = vpop.f32.mrb[0].mxu0 }
 0x165   :  { %v167_v18 = vadd.f32 %v270_v16, %v166_v17  ;;  %v340_v19 = vpop.f32.mrb[1].mxu0 }
 0x167   :  { %v170_v20 = vmax.f32 %v167_v18, 0.0 }
 0x169   :  { %374 = vmatmul.mubr.f32.vlgmr.msra.gmra.mrb[0].mxu1 %v170_v20 }
 0x23c   :  { %v260_v22 = vpop.f32.mrb[0].mxu1 }
 0x23d   :  { %v261_v23 = vadd.f32 %v271_v21, %v260_v22  ;;  %v375_v24 = vpop.f32.mrb[1].mxu1 }
 0x23f   :  { %264 = vst [vmem:[%s620_s7] sm:$0xff] %v261_v23 }

</bundles_post_ra>
